<compile_context>
chip_gen: v5e
topology: v5e:2x2
jax: 0.10.0
libtpu: 0.0.40
codegen_flags: <defaults>
</compile_context>

<pallas_src>
import functools
import math

import numpy as np

import jax
import jax.numpy as jnp
from jax.experimental import pallas as pl
from jax.experimental.pallas import tpu as pltpu


def _round_up(x: int, m: int) -> int:
    return ((x + m - 1) // m) * m


def _sinusoidal_kernel(t_ref, coef_ref, out_ref, *, use_mxu: bool):
    """One batch tile.

    t_ref:    [TILE_R, G+1] f32 packed timesteps, last column is the constant 1.0
    coef_ref: [G+1, W]      f32, rows 0..G-1 are group-masked frequencies, row G is the
                            cos phase shift (pi/2 on cos lanes, 0 elsewhere)
    out_ref:  [TILE_R, W]   W = G * dim, lane-dense output block
    """
    if use_mxu:
        # phase[r, l] = t[r, l // dim] * freq(l % dim) + shift(l % dim)  -- one MXU pass.
        phase = jnp.dot(t_ref[...], coef_ref[...],
                        preferred_element_type=jnp.float32)
    else:
        # G == 1: a single broadcast MAC is cheaper than driving the MXU.
        phase = t_ref[:, 0:1] * coef_ref[0:1, :] + coef_ref[1:2, :]

    # Argument reduction: r = phase - 2*pi*round(phase / (2*pi)), so |r| <= pi (+eps)
    # and the polynomial stays accurate for DDPM-sized timesteps (~1e3).
    two_pi = 2.0 * math.pi
    k = jnp.floor(phase * (1.0 / two_pi) + 0.5)
    r = phase - k * two_pi

    # Fold to [-pi/2, pi/2]: sin(pi - |r|) == sin(|r|); restore the sign (odd function).
    a = jnp.abs(r)
    folded = jnp.minimum(a, math.pi - a)
    x = jnp.where(r < 0.0, -folded, folded)

    # Odd degree-9 polynomial for sin on [-pi/2, pi/2] (Horner on x^2, pure VPU work;
    # truncation error ~3.6e-6, far inside the 2e-3 tolerance).
    x2 = x * x
    p = jnp.float32(1.0 / 362880.0)
    p = p * x2 + jnp.float32(-1.0 / 5040.0)
    p = p * x2 + jnp.float32(1.0 / 120.0)
    p = p * x2 + jnp.float32(-1.0 / 6.0)
    p = p * x2 + jnp.float32(1.0)
    out_ref[...] = (x * p).astype(out_ref.dtype)


def sinusoidal_position_embeddings(time: jax.Array, dim: int,
                                   out_dtype=jnp.float32) -> jax.Array:
    """JAX/Pallas equivalent of SinusoidalPositionEmbeddings(dim)(time) -> [B, dim]."""
    assert time.ndim == 1, "time must be shape [batch_size]"
    assert dim >= 2, "dim must be >= 2"
    b = time.shape[0]
    half = dim // 2
    # NOTE: dim in {2, 3} divides by zero in the PyTorch module; guard it here.
    scale = math.log(10000.0) / max(half - 1, 1)

    # Lane-packing factor: output row width W = lcm(dim, 128) (<= 512), G timesteps per row,
    # so stores are unmasked full-lane vst.  Fall back to G=1 when lcm is too large.
    if dim % 128 == 0:
        groups = 1
    else:
        w_lcm = math.lcm(dim, 128)
        groups = (w_lcm // dim) if w_lcm <= 512 else 1
    w = groups * dim

    # Per-lane constant tables, built once on host in float64 (hoisted out of the kernel).
    lane = np.arange(w)
    j = lane % dim                       # position inside one embedding
    grp = lane // dim                    # which packed timestep this lane belongs to
    f_idx = np.where(j < half, j, j - half)
    freq = np.exp(-scale * f_idx.astype(np.float64))
    freq = np.where(j < 2 * half, freq, 0.0)            # odd dim: trailing pad col -> 0
    shift = np.where((j >= half) & (j < 2 * half), np.pi / 2.0, 0.0)
    coef = np.zeros((groups + 1, w), np.float64)
    coef[:groups] = np.where(grp[None, :] == np.arange(groups)[:, None],
                             freq[None, :], 0.0)        # group-masked frequencies
    coef[groups] = shift                                # folded into the matmul

    itemsize = jnp.dtype(out_dtype).itemsize

    # Per-generation VMEM-driven tile sizing.
    try:
        vmem_cap = int(pltpu.get_tpu_info().vmem_capacity_bytes)
    except Exception:  # pragma: no cover - conservative fallback (v7x-sized VMEM)
        vmem_cap = 64 * 1024 * 1024
    out_block_cap = (8 << 20) if vmem_cap >= (128 << 20) else (4 << 20)

    rows = -(-b // groups)               # one row = `groups` timesteps
    out_row_bytes = w * itemsize
    tile_r = max(8, out_block_cap // max(out_row_bytes, 1))
    if rows > 8:
        # Keep >= 2 grid steps so v7x's two TensorCores can split the grid.
        tile_r = min(tile_r, _round_up(-(-rows // 2), 8))
    tile_r = min(tile_r, _round_up(rows, 8))             # don't over-pad tiny batches
    tile_r = max(8, (tile_r // 8) * 8)                    # sublane multiple of 8
    rows_pad = _round_up(rows, tile_r)
    b_pad = rows_pad * groups

    t32 = jnp.asarray(time, jnp.float32)
    t2d = jnp.pad(t32, (0, b_pad - b)).reshape(rows_pad, groups)
    t_aug = jnp.concatenate([t2d, jnp.ones((rows_pad, 1), jnp.float32)], axis=1)
    coef_j = jnp.asarray(coef, jnp.float32)               # [G+1, W]

    # Explicit VMEM budget: double-buffered out + t blocks, resident coef, slack.
    out_block_bytes = tile_r * w * itemsize
    t_block_bytes = tile_r * (groups + 1) * 4
    coef_bytes = (groups + 1) * w * 4
    needed = 2 * out_block_bytes + 2 * t_block_bytes + 2 * coef_bytes + (2 << 20)
    vmem_limit = int(min(vmem_cap // 2, max(needed, 16 << 20)))

    kernel = functools.partial(_sinusoidal_kernel, use_mxu=(groups > 1))

    out_packed = pl.pallas_call(
        kernel,
        out_shape=jax.ShapeDtypeStruct((rows_pad, w), out_dtype),
        grid=(rows_pad // tile_r,),
        in_specs=[
            pl.BlockSpec((tile_r, groups + 1), lambda i: (i, 0)),
            pl.BlockSpec((groups + 1, w), lambda i: (0, 0)),   # grid-invariant (resident)
        ],
        out_specs=pl.BlockSpec((tile_r, w), lambda i: (i, 0)),
        compiler_params=pltpu.CompilerParams(
            dimension_semantics=("parallel",),                 # v7x: 2 TCs share the grid
            vmem_limit_bytes=vmem_limit),
        cost_estimate=pl.CostEstimate(
            flops=int(2 * rows_pad * w * (groups + 1) + 12 * rows_pad * w),
            transcendentals=0,
            bytes_accessed=int(rows_pad * w * itemsize
                               + rows_pad * (groups + 1) * 4
                               + (groups + 1) * w * 4)),
    )(t_aug, coef_j)

    # Row-major bytes of [rows_pad, G*dim] == [b_pad, dim]: reshape is free.
    return out_packed.reshape(b_pad, dim)[:b]


def _reference_np(time, dim: int) -> np.ndarray:
    """float64 NumPy mirror of the PyTorch module."""
    t = np.asarray(time, np.float64)
    half = dim // 2
    scale = math.log(10000.0) / max(half - 1, 1)
    freq = np.exp(-scale * np.arange(half, dtype=np.float64))
    args = t[:, None] * freq[None, :]
    emb = np.concatenate([np.sin(args), np.cos(args)], axis=-1)
    if dim % 2 == 1:
        emb = np.pad(emb, ((0, 0), (0, 1)))
    return emb


if __name__ == "__main__":
    # Case 1: typical DDPM setting (even dim < 128 -> lane-packed, G = 4, MXU phase).
    batch, dim = 8, 32
    time = jax.random.randint(jax.random.PRNGKey(0), (batch,), 0, 1000).astype(jnp.float32)
    out = jax.block_until_ready(sinusoidal_position_embeddings(time, dim))
    ref = _reference_np(np.asarray(time), dim)
    assert out.shape == (batch, dim), out.shape
    err = float(np.max(np.abs(np.asarray(out, np.float64) - ref)))
    # f32 phase for arguments up to ~1e3 only agrees with float64 to ~1e-4.
    assert err < 2e-3, f"max abs error {err} vs float64 reference"

    # Case 2: odd dim (trailing zero pad) on the unpacked (G = 1) fallback path.
    batch2, dim2 = 5, 33
    time2 = jax.random.randint(jax.random.PRNGKey(1), (batch2,), 0, 1000).astype(jnp.float32)
    out2 = jax.block_until_ready(sinusoidal_position_embeddings(time2, dim2))
    ref2 = _reference_np(np.asarray(time2), dim2)
    assert out2.shape == (batch2, dim2), out2.shape
    err2 = float(np.max(np.abs(np.asarray(out2, np.float64) - ref2)))
    assert err2 < 2e-3, f"max abs error {err2} vs float64 reference"

    # Case 3: non-divisor even dim -> lcm lane packing (dim = 48 -> W = 384, G = 8).
    batch3, dim3 = 7, 48
    time3 = jax.random.randint(jax.random.PRNGKey(2), (batch3,), 0, 1000).astype(jnp.float32)
    out3 = jax.block_until_ready(sinusoidal_position_embeddings(time3, dim3))
    ref3 = _reference_np(np.asarray(time3), dim3)
    assert out3.shape == (batch3, dim3), out3.shape
    err3 = float(np.max(np.abs(np.asarray(out3, np.float64) - ref3)))
    assert err3 < 2e-3, f"max abs error {err3} vs float64 reference"

    print("KERNEL_OK")
</pallas_src>

<mosaic_0001>
module attributes {stable_mosaic.version = 11 : i64} {
  func.func @_sinusoidal_kernel(%arg0: i32, %arg1: memref<8x5xf32, #tpu.memory_space<vmem>>, %arg2: memref<5x128xf32, #tpu.memory_space<vmem>>, %arg3: memref<8x128xf32, #tpu.memory_space<vmem>>) attributes {dimension_semantics = [#tpu.dimension_semantics<parallel>], iteration_bounds = array<i64: 1>, scalar_prefetch = 0 : i64, scratch_operands = 0 : i64, tpu.core_type = #tpu.core_type<tc>, window_params = [{transform_indices = @transform_0, window_bounds = array<i64: 8, 5>}, {pipeline_mode = #tpu.pipeline_mode<synchronous>, transform_indices = @transform_1, window_bounds = array<i64: 5, 128>}, {transform_indices = @transform_2, window_bounds = array<i64: 8, 128>}]} {
    %c0 = arith.constant 0 : index
    %c0_0 = arith.constant 0 : index
    %0 = vector.load %arg1[%c0, %c0_0] : memref<8x5xf32, #tpu.memory_space<vmem>>, vector<8x5xf32>
    %c0_1 = arith.constant 0 : index
    %c0_2 = arith.constant 0 : index
    %1 = vector.load %arg2[%c0_1, %c0_2] : memref<5x128xf32, #tpu.memory_space<vmem>>, vector<5x128xf32>
    %cst = arith.constant dense<0.000000e+00> : vector<8x128xf32>
    %2 = tpu.matmul %0, %1, %cst {dimension_numbers = #tpu.dot_dimension_numbers<[1], [0], [0], [1], [0, 0, 1, 1], [], []>} : vector<8x5xf32>, vector<5x128xf32>, vector<8x128xf32> -> vector<8x128xf32>
    %cst_3 = arith.constant 0.159154937 : f32
    %3 = vector.broadcast %cst_3 : f32 to vector<8x128xf32>
    %4 = arith.mulf %2, %3 : vector<8x128xf32>
    %cst_4 = arith.constant 5.000000e-01 : f32
    %5 = vector.broadcast %cst_4 : f32 to vector<8x128xf32>
    %6 = arith.addf %4, %5 : vector<8x128xf32>
    %7 = math.floor %6 : vector<8x128xf32>
    %cst_5 = arith.constant 6.28318548 : f32
    %8 = vector.broadcast %cst_5 : f32 to vector<8x128xf32>
    %9 = arith.mulf %7, %8 : vector<8x128xf32>
    %10 = arith.subf %2, %9 : vector<8x128xf32>
    %11 = math.absf %10 : vector<8x128xf32>
    %cst_6 = arith.constant 3.14159274 : f32
    %12 = vector.broadcast %cst_6 : f32 to vector<8x128xf32>
    %13 = arith.subf %12, %11 : vector<8x128xf32>
    %14 = arith.minimumf %11, %13 : vector<8x128xf32>
    %cst_7 = arith.constant 0.000000e+00 : f32
    %15 = vector.broadcast %cst_7 : f32 to vector<8x128xf32>
    %16 = arith.cmpf olt, %10, %15 : vector<8x128xf32>
    %cst_8 = arith.constant 0.000000e+00 : f32
    %17 = vector.broadcast %cst_8 : f32 to vector<8x128xf32>
    %18 = arith.subf %17, %14 : vector<8x128xf32>
    %19 = arith.select %16, %18, %14 : vector<8x128xi1>, vector<8x128xf32>
    %20 = arith.mulf %19, %19 : vector<8x128xf32>
    %cst_9 = arith.constant 2.75573188E-6 : f32
    %21 = vector.broadcast %cst_9 : f32 to vector<8x128xf32>
    %22 = arith.mulf %21, %20 : vector<8x128xf32>
    %cst_10 = arith.constant -1.98412701E-4 : f32
    %23 = vector.broadcast %cst_10 : f32 to vector<8x128xf32>
    %24 = arith.addf %22, %23 : vector<8x128xf32>
    %25 = arith.mulf %24, %20 : vector<8x128xf32>
    %cst_11 = arith.constant 0.00833333377 : f32
    %26 = vector.broadcast %cst_11 : f32 to vector<8x128xf32>
    %27 = arith.addf %25, %26 : vector<8x128xf32>
    %28 = arith.mulf %27, %20 : vector<8x128xf32>
    %cst_12 = arith.constant -0.166666672 : f32
    %29 = vector.broadcast %cst_12 : f32 to vector<8x128xf32>
    %30 = arith.addf %28, %29 : vector<8x128xf32>
    %31 = arith.mulf %30, %20 : vector<8x128xf32>
    %cst_13 = arith.constant 1.000000e+00 : f32
    %32 = vector.broadcast %cst_13 : f32 to vector<8x128xf32>
    %33 = arith.addf %31, %32 : vector<8x128xf32>
    %34 = arith.mulf %19, %33 : vector<8x128xf32>
    %c0_14 = arith.constant 0 : index
    %c0_15 = arith.constant 0 : index
    %35 = vector.load %arg3[%c0_14, %c0_15] : memref<8x128xf32, #tpu.memory_space<vmem>>, vector<8x128xf32>
    tpu.vector_store %arg3[%c0_14, %c0_15], %34 {strides = array<i32>} : memref<8x128xf32, #tpu.memory_space<vmem>>, vector<8x128xf32>,
    return
  }
  func.func @transform_0(%arg0: i32) -> (i32, i32) {
    %c0_i32 = arith.constant 0 : i32
    %c0_i32_0 = arith.constant 0 : i32
    return %arg0, %c0_i32 : i32, i32
  }
  func.func @transform_1(%arg0: i32) -> (i32, i32) {
    %c0_i32 = arith.constant 0 : i32
    %c0_i32_0 = arith.constant 0 : i32
    %c0_i32_1 = arith.constant 0 : i32
    return %c0_i32, %c0_i32_0 : i32, i32
  }
  func.func @transform_2(%arg0: i32) -> (i32, i32) {
    %c0_i32 = arith.constant 0 : i32
    %c0_i32_0 = arith.constant 0 : i32
    return %arg0, %c0_i32 : i32, i32
  }
}

</mosaic_0001>

<bundles_post_ra>
// kernel: tpu_custom_call.1
= control target key start
LH: loop header
LB: loop body
LE: loop exit
PB: predicated region body
PF: predicated region fallthrough
CT: control target
= control target key end

     0   :  { %7 = vsyncpa [#allocation3], 0  ;;  %s220_s0 = inlined_call_operand.hbm [shape: f32[8,5], index: 0, kind: input, shape index: {}]   ;;  %s221_s1 = inlined_call_operand.hbm [shape: f32[5,128], index: 1, kind: input, shape index: {}]   ;;  %s222_s2 = inlined_call_operand.hbm [shape: f32[8,128], index: 2, kind: output, shape index: {}]  }
   0x1   :  { %8 = vsyncpa [#allocation6], 0 }
   0x2   :  { %9 = vsyncpa [#allocation4], 0  ;;  %s15_s11 = sshll.u32 %s220_s0, 4  ;;  %s193_s12 = smov [#allocation2]   ;;  %s16_s11 = int_to_ptr.hbm [resolvable:$true] %s15_s11 }
   0x3   :  { %s17_s13 = sshll.u32 %s193_s12, 4  ;;  %s26_s16 = sshll.u32 %s221_s1, 4  ;;  %s18_s13 = int_to_ptr.vmem [resolvable:$true] %s17_s13  ;;  %s27_s16 = int_to_ptr.hbm [resolvable:$true] %s26_s16 }
   0x4   :  { %20 = dma.hbm_to_vmem [thread:$0]  %s16_s11, 128, %s18_s13, [#allocation3]  }
   0x5   :  { %s194_s17 = smov [#allocation5]  }
   0x6   :  { %s28_s18 = sshll.u32 %s194_s17, 4  ;;  %s29_s18 = int_to_ptr.vmem [resolvable:$true] %s28_s18 }
   0x7   :  { %31 = dma.hbm_to_vmem [thread:$0]  %s27_s16, 128, %s29_s18, [#allocation6]  }
   0x8   :  { %187 = dma.done.wait [#allocation3], 128  }
   0x9   :  { %188 = vsyncadd [#allocation3], 4294967168 }
   0xa   :  { %189 = dma.done.wait [#allocation6], 128  }
   0xb   :  { %190 = vsyncadd [#allocation6], 4294967168  ;;  %vm46_vm0 = vcmask 1044480   ;;  %vm42_vm1 = vcmask 39936   ;;  %v41_v0 = vld [vmem:[#allocation5] sm:$0x1f] }
   0xc   :  { %v40_v1 = vld [vmem:[#allocation2] sm:$0xff]  ;;  %110 = vmatpush.msk.msra.mxu0 %vm46_vm0, %v41_v0  ;;  %s195_s0 = smov [#allocation7]   ;;  %s99_s21 = sshll.u32 %s222_s2, 4  ;;  %s100_s21 = int_to_ptr.hbm [resolvable:$true] %s99_s21 }
   0xd   :  { %111 = vmatmul.msk.f32.vlgmr.msra.gmra.mxu0 %vm42_vm1, %v40_v1  ;;  %s97_s1 = sshll.u32 %s195_s0, 4  ;;  %s98_s1 = int_to_ptr.vmem [resolvable:$true] %s97_s1 }
  0x8a   :  { %v67_v2 = vpop.f32.mrf.mxu0 }
  0x8b   :  { %v70_v3 = vmul.f32 0.15915494, %v67_v2 }
  0x8d   :  { %v71_v4 = vadd.f32 0.5, %v70_v3 }
  0x8f   :  { %v72_v5 = vfloor.f32 %v71_v4 }
  0x91   :  { %v73_v6 = vmul.f32 6.2831855, %v72_v5 }
  0x93   :  { %v74_v7 = vsub.f32 %v67_v2, %v73_v6 }
  0x95   :  { %v75_v8 = vand.u32 2147483647, %v74_v7  ;;  %vm78_vm2 = vcmp.lt.f32.partialorder %v74_v7, 0.0 }
  0x97   :  { %v76_v9 = vsub.f32 3.1415927, %v75_v8 }
  0x99   :  { %v77_v10 = vmin.f32 %v75_v8, %v76_v9 }
  0x9b   :  { %v79_v11 = vsub.f32 0.0, %v77_v10 }
  0x9d   :  { %v80_v12 = vsel %vm78_vm2, %v79_v11, %v77_v10 }
  0x9e   :  { %v81_v13 = vmul.f32 %v80_v12, %v80_v12 }
  0xa0   :  { %v82_v14 = vmul.f32 2.7557319e-06, %v81_v13 }
  0xa2   :  { %v83_v15 = vadd.f32 -0.0001984127, %v82_v14 }
  0xa4   :  { %v84_v16 = vmul.f32 %v83_v15, %v81_v13 }
  0xa6   :  { %v85_v17 = vadd.f32 0.008333334, %v84_v16 }
  0xa8   :  { %v86_v18 = vmul.f32 %v85_v17, %v81_v13 }
  0xaa   :  { %v87_v19 = vadd.f32 -0.16666667, %v86_v18 }
  0xac   :  { %v88_v20 = vmul.f32 %v87_v19, %v81_v13 }
  0xae   :  { %v89_v21 = vadd.f32 1.0, %v88_v20 }
  0xb0   :  { %v90_v22 = vmul.f32 %v89_v21, %v80_v12 }
  0xb2   :  { %91 = vst [vmem:[#allocation7] sm:$0xff] %v90_v22 }
  0xb3   :  { %102 = dma.vmem_to_hbm [thread:$0]  %s98_s1, 128, %s100_s21, [#allocation4]  }
  0xb4   :  { %191 = dma.done.wait [#allocation4], 128  }
  0xb5   :  { %192 = vsyncadd [#allocation4], 4294967168 }
  0xb6   :  { %107 = vsyncpa [#allocation3], 1 }
  0xb7   :  { %108 = vsyncpa [#allocation6], 1 }
  0xb8   :  { %109 = vsyncpa [#allocation4], 1 }

</bundles_post_ra>
